<compile_context>
chip_gen: v7x
topology: tpu7x:2x2x1
jax: 0.10.0
libtpu: 0.0.40
codegen_flags: <defaults>
</compile_context>

<pallas_src>
import functools

import jax
import jax.numpy as jnp
from jax.experimental import pallas as pl
from jax.experimental.pallas import tpu as pltpu


def _dice_ce_kernel(x_ref, t_ref, out_ref, sp_acc, dice_acc, num_acc, den_acc,
                    *, inv_total_elems, inv_total_rows):
    i = pl.program_id(1)              # row-block within this shard
    k = pl.program_id(2)              # K (reduction) block -- last grid axis
    last_i = pl.num_programs(1) - 1
    last_k = pl.num_programs(2) - 1

    @pl.when(jnp.logical_and(i == 0, k == 0))
    def _():                          # start of this shard
        sp_acc[...] = jnp.zeros_like(sp_acc)
        dice_acc[...] = jnp.zeros_like(dice_acc)

    @pl.when(k == 0)
    def _():                          # start of a new row block
        num_acc[...] = jnp.zeros_like(num_acc)
        den_acc[...] = jnp.zeros_like(den_acc)

    x = x_ref[...].astype(jnp.float32)    # (TR, TK) logits block
    t = t_ref[...].astype(jnp.float32)    # (TR, TK) target block

    # softplus(x) = relu(x) + log1p(exp(-|x|)); CE elem = softplus(x) - x*t.
    # The -x*t term is recovered from the dice numerator once per row block.
    sp = jnp.maximum(x, 0.0) + jnp.log1p(jnp.exp(-jnp.abs(x)))
    xt = x * t
    xpt = x + t

    tk = x.shape[1]
    acc_w = sp_acc.shape[1]

    def lane_fold(v):
        # (TR, TK) -> (TR, acc_w): sum 128-lane groups with pure VPU adds
        # (lane-aligned static slices = vreg selection, no XLU).
        acc = v[:, 0:acc_w]
        for j in range(1, tk // acc_w):
            acc = acc + v[:, j * acc_w:(j + 1) * acc_w]
        return acc

    sp_acc[...] += lane_fold(sp)
    num_acc[...] += lane_fold(xt)
    den_acc[...] += lane_fold(xpt)

    @pl.when(k == last_k)
    def _():                          # this row block's spatial sums are complete
        # Fold CE = sum(softplus) - sum(x*t) using the dice numerator partials.
        sp_acc[...] -= num_acc[...]
        num_row = jnp.sum(num_acc[...], axis=1, keepdims=True)   # one XLU reduce
        den_row = jnp.sum(den_acc[...], axis=1, keepdims=True)   # per row block
        dice_acc[...] += 1.0 - (2.0 * num_row + 1.0) / (den_row + 1.0)  # smooth=1

    @pl.when(jnp.logical_and(i == last_i, k == last_k))
    def _():                          # end of shard: single cross-sublane reduce
        partial = (jnp.sum(sp_acc[...]) * inv_total_elems
                   + jnp.sum(dice_acc[...]) * inv_total_rows)
        out_ref[...] = jnp.full(out_ref.shape, partial, dtype=out_ref.dtype)


def _pick_tile(n, mult, cap, prefer_even_quotient=False):
    """Largest divisor of n that is a multiple of `mult` and <= max(mult, cap).

    If prefer_even_quotient, prefer a divisor whose quotient n//d is even (so a
    2-wide shard axis exists) as long as it is at least half the best tile.  If
    nothing fits under the cap, take the smallest legal divisor above it rather
    than a full-extent block."""
    cap = max(mult, min(n, int(cap)))
    best = None
    best_even = None
    for d in range(mult, cap + 1, mult):
        if n % d == 0:
            best = d
            if (n // d) % 2 == 0:
                best_even = d
    if best is None:
        d = cap + (mult - cap % mult if cap % mult else mult)
        while d < n:
            if n % d == 0:
                return d
            d += mult
        return n
    if prefer_even_quotient and best_even is not None and 2 * best_even >= best:
        return best_even
    return best


def binary_dice_ce(logits, target, *, target_block_bytes=4 << 20):
    """loss = BCEWithLogits(logits, target).mean() + mean_{n,c}(1 - dice_nc).

    `target_block_bytes` budgets the per-input block in f32 units (the kernel
    upcasts to f32 in VMEM).  Callers should pass bf16 logits and bool/int8
    targets when available -- the kernel streams them in their native dtype,
    roughly halving HBM traffic on the bandwidth-bound v5e/v6e path."""
    N, C, H, W = logits.shape
    R, K = N * C, H * W

    # Feed native dtypes; the kernel upcasts to f32 in VMEM.
    if target.dtype == jnp.bool_:
        target = target.astype(jnp.int8)
    x = logits.reshape(R, K)
    t = target.reshape(R, K)

    # ---- Tile selection, budgeted on the f32 working set per input block. ----
    eff_item = 4                       # kernel upcasts to f32
    row_bytes = K * eff_item
    if 8 * row_bytes <= target_block_bytes:
        # A (>=8)-row full-K stripe fits the budget: keep K un-tiled.
        tk = K
        tr = _pick_tile(R, 8, target_block_bytes // row_bytes,
                        prefer_even_quotient=True)
    else:
        tr = _pick_tile(R, 8, 8)
        tk = _pick_tile(K, 128, max(128, target_block_bytes // (tr * eff_item)))
    rb, kb = R // tr, K // tk

    # Leading "parallel" axis: shards row blocks across TensorCores on megacore
    # parts (v7x); runs serially (and costs nothing) on single-TC chips.
    num_shards = 2 if (rb % 2 == 0 and rb >= 2) else 1
    rb_per_shard = rb // num_shards

    # Lane-dense accumulator width: 128 when tk is a lane multiple, else tk
    # (only possible when tk == K < 128 or K has no 128-multiple divisor).
    acc_w = 128 if tk % 128 == 0 else tk

    # ---- VMEM budget: 2 inputs x 2 pipeline buffers (native dtype) + f32
    # upcast / elementwise temporaries + accumulators, capped at 3/4 of the
    # chip's per-core VMEM (v7x: 64 MiB -> 48 MiB; v5e/v6e: 128 MiB -> 96). ----
    itemsize = max(jnp.dtype(x.dtype).itemsize, jnp.dtype(t.dtype).itemsize)
    in_bytes = 2 * 2 * tr * tk * itemsize
    temp_bytes = 4 * tr * tk * 4                      # f32 upcasts + products
    scratch_bytes = (3 * tr * acc_w + tr) * 4 + num_shards * 8 * 128 * 4
    need = in_bytes + temp_bytes + scratch_bytes + (2 << 20)
    try:
        vmem_cap = int(pltpu.get_tpu_info().vmem_capacity_bytes)
    except Exception:
        vmem_cap = 64 << 20                            # conservative (v7x per-TC)
    vmem_limit = int(min(vmem_cap * 3 // 4, max(32 << 20, need)))

    kernel = functools.partial(
        _dice_ce_kernel,
        inv_total_elems=1.0 / float(R * K),   # CE: mean over all elements
        inv_total_rows=1.0 / float(R),        # dice: mean over (N, C)
    )

    out = pl.pallas_call(
        kernel,
        out_shape=jax.ShapeDtypeStruct((num_shards * 8, 128), jnp.float32),
        grid_spec=pltpu.PrefetchScalarGridSpec(
            num_scalar_prefetch=0,
            grid=(num_shards, rb_per_shard, kb),
            in_specs=[
                pl.BlockSpec((tr, tk), lambda c, i, k: (c * rb_per_shard + i, k)),
                pl.BlockSpec((tr, tk), lambda c, i, k: (c * rb_per_shard + i, k)),
            ],
            out_specs=pl.BlockSpec((8, 128), lambda c, i, k: (c, 0)),
            scratch_shapes=[
                pltpu.VMEM((tr, acc_w), jnp.float32),  # softplus (CE) lane partials
                pltpu.VMEM((tr, 1), jnp.float32),      # dice-loss per-row partials
                pltpu.VMEM((tr, acc_w), jnp.float32),  # dice numerator lane partials
                pltpu.VMEM((tr, acc_w), jnp.float32),  # dice denominator lane partials
            ],
        ),
        compiler_params=pltpu.CompilerParams(
            dimension_semantics=("parallel", "arbitrary", "arbitrary"),
            vmem_limit_bytes=vmem_limit,
        ),
    )(x, t)

    # Each shard wrote its (already globally-normalized) partial; add them.
    return jnp.sum(out.reshape(num_shards, 8, 128)[:, 0, 0])


def _reference(logits, target):
    x = logits.astype(jnp.float32)
    t = target.astype(jnp.float32)
    ce = jnp.mean(jnp.maximum(x, 0.0) - x * t + jnp.log1p(jnp.exp(-jnp.abs(x))))
    num = jnp.sum(x * t, axis=(2, 3))
    den = jnp.sum(x, axis=(2, 3)) + jnp.sum(t, axis=(2, 3))
    dice_score = (2.0 * num + 1.0) / (den + 1.0)
    return ce + jnp.mean(1.0 - dice_score)


if __name__ == "__main__":
    key = jax.random.PRNGKey(0)
    k1, k2, k3, k4 = jax.random.split(key, 4)

    # Module-shaped small test: (N, C, H, W) = (2, 4, 16, 16), single-step grid.
    N, C, H, W = 2, 4, 16, 16
    logits = jax.random.normal(k1, (N, C, H, W), dtype=jnp.float32)
    target = jax.random.bernoulli(k2, 0.5, (N, C, H, W)).astype(jnp.float32)
    loss = jax.block_until_ready(binary_dice_ce(logits, target))
    ref = jax.block_until_ready(_reference(logits, target))
    assert jnp.allclose(loss, ref, rtol=1e-5, atol=1e-5), (loss, ref)

    # Larger case with a tiny block budget to exercise the row/K tiling and the
    # two-shard ("parallel") path.
    N2, C2, H2, W2 = 4, 8, 32, 32
    logits2 = jax.random.normal(k3, (N2, C2, H2, W2), dtype=jnp.float32)
    target2 = jax.random.bernoulli(k4, 0.5, (N2, C2, H2, W2)).astype(jnp.float32)
    loss2 = jax.block_until_ready(
        binary_dice_ce(logits2, target2, target_block_bytes=8192))
    ref2 = jax.block_until_ready(_reference(logits2, target2))
    assert jnp.allclose(loss2, ref2, rtol=1e-5, atol=1e-5), (loss2, ref2)

    # Narrow-dtype path (bf16 logits, int8 targets) -- kernel upcasts in VMEM.
    loss3 = jax.block_until_ready(
        binary_dice_ce(logits2.astype(jnp.bfloat16),
                       target2.astype(jnp.int8), target_block_bytes=8192))
    assert jnp.allclose(loss3, ref2, rtol=2e-2, atol=2e-2), (loss3, ref2)

    print("KERNEL_OK")
</pallas_src>

<mosaic_0001>
module attributes {stable_mosaic.version = 11 : i64} {
  func.func @_dice_ce_kernel(%arg0: i32, %arg1: i32, %arg2: i32, %arg3: memref<8x256xf32, #tpu.memory_space<vmem>>, %arg4: memref<8x256xf32, #tpu.memory_space<vmem>>, %arg5: memref<8x128xf32, #tpu.memory_space<vmem>>, %arg6: memref<8x128xf32, #tpu.memory_space<vmem>>, %arg7: memref<8x1xf32, #tpu.memory_space<vmem>>, %arg8: memref<8x128xf32, #tpu.memory_space<vmem>>, %arg9: memref<8x128xf32, #tpu.memory_space<vmem>>) attributes {dimension_semantics = [#tpu.dimension_semantics<parallel>, #tpu.dimension_semantics<arbitrary>, #tpu.dimension_semantics<arbitrary>], iteration_bounds = array<i64: 1, 1, 1>, scalar_prefetch = 0 : i64, scratch_operands = 4 : i64, tpu.core_type = #tpu.core_type<tc>, window_params = [{transform_indices = @transform_0, window_bounds = array<i64: 8, 256>}, {transform_indices = @transform_1, window_bounds = array<i64: 8, 256>}, {transform_indices = @transform_2, window_bounds = array<i64: 8, 128>}]} {
    %c0_i32 = arith.constant 0 : i32
    %0 = arith.cmpi eq, %arg1, %c0_i32 : i32
    %c0_i32_0 = arith.constant 0 : i32
    %1 = arith.cmpi eq, %arg2, %c0_i32_0 : i32
    %2 = arith.andi %0, %1 : i1
    %3 = arith.extui %2 : i1 to i32
    %c0_i32_1 = arith.constant 0 : i32
    %4 = arith.cmpi ne, %3, %c0_i32_1 : i32
    scf.if %4 {
      %cst_25 = arith.constant 0.000000e+00 : f32
      %46 = vector.broadcast %cst_25 : f32 to vector<8x128xf32>
      %c0_26 = arith.constant 0 : index
      %c0_27 = arith.constant 0 : index
      %47 = vector.load %arg6[%c0_26, %c0_27] : memref<8x128xf32, #tpu.memory_space<vmem>>, vector<8x128xf32>
      tpu.vector_store %arg6[%c0_26, %c0_27], %46 {strides = array<i32>} : memref<8x128xf32, #tpu.memory_space<vmem>>, vector<8x128xf32>,
      %cst_28 = arith.constant 0.000000e+00 : f32
      %48 = vector.broadcast %cst_28 : f32 to vector<8x1xf32>
      %c0_29 = arith.constant 0 : index
      %c0_30 = arith.constant 0 : index
      %49 = vector.load %arg7[%c0_29, %c0_30] : memref<8x1xf32, #tpu.memory_space<vmem>>, vector<8x1xf32>
      tpu.vector_store %arg7[%c0_29, %c0_30], %48 {strides = array<i32>} : memref<8x1xf32, #tpu.memory_space<vmem>>, vector<8x1xf32>,
    } else {
    }
    %c0_i32_2 = arith.constant 0 : i32
    %5 = arith.cmpi eq, %arg2, %c0_i32_2 : i32
    %6 = arith.extui %5 : i1 to i32
    %c0_i32_3 = arith.constant 0 : i32
    %7 = arith.cmpi ne, %6, %c0_i32_3 : i32
    scf.if %7 {
      %cst_25 = arith.constant 0.000000e+00 : f32
      %46 = vector.broadcast %cst_25 : f32 to vector<8x128xf32>
      %c0_26 = arith.constant 0 : index
      %c0_27 = arith.constant 0 : index
      %47 = vector.load %arg8[%c0_26, %c0_27] : memref<8x128xf32, #tpu.memory_space<vmem>>, vector<8x128xf32>
      tpu.vector_store %arg8[%c0_26, %c0_27], %46 {strides = array<i32>} : memref<8x128xf32, #tpu.memory_space<vmem>>, vector<8x128xf32>,
      %cst_28 = arith.constant 0.000000e+00 : f32
      %48 = vector.broadcast %cst_28 : f32 to vector<8x128xf32>
      %c0_29 = arith.constant 0 : index
      %c0_30 = arith.constant 0 : index
      %49 = vector.load %arg9[%c0_29, %c0_30] : memref<8x128xf32, #tpu.memory_space<vmem>>, vector<8x128xf32>
      tpu.vector_store %arg9[%c0_29, %c0_30], %48 {strides = array<i32>} : memref<8x128xf32, #tpu.memory_space<vmem>>, vector<8x128xf32>,
    } else {
    }
    %c0 = arith.constant 0 : index
    %c0_4 = arith.constant 0 : index
    %8 = vector.load %arg3[%c0, %c0_4] : memref<8x256xf32, #tpu.memory_space<vmem>>, vector<8x256xf32>
    %c0_5 = arith.constant 0 : index
    %c0_6 = arith.constant 0 : index
    %9 = vector.load %arg4[%c0_5, %c0_6] : memref<8x256xf32, #tpu.memory_space<vmem>>, vector<8x256xf32>
    %cst = arith.constant 0.000000e+00 : f32
    %10 = vector.broadcast %cst : f32 to vector<8x256xf32>
    %11 = arith.maximumf %8, %10 : vector<8x256xf32>
    %12 = math.absf %8 : vector<8x256xf32>
    %cst_7 = arith.constant 0.000000e+00 : f32
    %13 = vector.broadcast %cst_7 : f32 to vector<8x256xf32>
    %14 = arith.subf %13, %12 : vector<8x256xf32>
    %15 = math.exp %14 : vector<8x256xf32>
    %16 = math.log1p %15 : vector<8x256xf32>
    %17 = arith.addf %11, %16 : vector<8x256xf32>
    %18 = arith.mulf %8, %9 : vector<8x256xf32>
    %19 = arith.addf %8, %9 : vector<8x256xf32>
    %c0_8 = arith.constant 0 : index
    %c0_9 = arith.constant 0 : index
    %20 = vector.load %arg6[%c0_8, %c0_9] : memref<8x128xf32, #tpu.memory_space<vmem>>, vector<8x128xf32>
    %21 = vector.extract_strided_slice %17 {offsets = [0, 0], sizes = [8, 128], strides = [1, 1]} : vector<8x256xf32> to vector<8x128xf32>
    %22 = vector.extract_strided_slice %17 {offsets = [0, 128], sizes = [8, 128], strides = [1, 1]} : vector<8x256xf32> to vector<8x128xf32>
    %23 = arith.addf %21, %22 : vector<8x128xf32>
    %24 = arith.addf %20, %23 : vector<8x128xf32>
    %c0_10 = arith.constant 0 : index
    %c0_11 = arith.constant 0 : index
    %25 = vector.load %arg6[%c0_10, %c0_11] : memref<8x128xf32, #tpu.memory_space<vmem>>, vector<8x128xf32>
    tpu.vector_store %arg6[%c0_10, %c0_11], %24 {strides = array<i32>} : memref<8x128xf32, #tpu.memory_space<vmem>>, vector<8x128xf32>,
    %c0_12 = arith.constant 0 : index
    %c0_13 = arith.constant 0 : index
    %26 = vector.load %arg8[%c0_12, %c0_13] : memref<8x128xf32, #tpu.memory_space<vmem>>, vector<8x128xf32>
    %27 = vector.extract_strided_slice %18 {offsets = [0, 0], sizes = [8, 128], strides = [1, 1]} : vector<8x256xf32> to vector<8x128xf32>
    %28 = vector.extract_strided_slice %18 {offsets = [0, 128], sizes = [8, 128], strides = [1, 1]} : vector<8x256xf32> to vector<8x128xf32>
    %29 = arith.addf %27, %28 : vector<8x128xf32>
    %30 = arith.addf %26, %29 : vector<8x128xf32>
    %c0_14 = arith.constant 0 : index
    %c0_15 = arith.constant 0 : index
    %31 = vector.load %arg8[%c0_14, %c0_15] : memref<8x128xf32, #tpu.memory_space<vmem>>, vector<8x128xf32>
    tpu.vector_store %arg8[%c0_14, %c0_15], %30 {strides = array<i32>} : memref<8x128xf32, #tpu.memory_space<vmem>>, vector<8x128xf32>,
    %c0_16 = arith.constant 0 : index
    %c0_17 = arith.constant 0 : index
    %32 = vector.load %arg9[%c0_16, %c0_17] : memref<8x128xf32, #tpu.memory_space<vmem>>, vector<8x128xf32>
    %33 = vector.extract_strided_slice %19 {offsets = [0, 0], sizes = [8, 128], strides = [1, 1]} : vector<8x256xf32> to vector<8x128xf32>
    %34 = vector.extract_strided_slice %19 {offsets = [0, 128], sizes = [8, 128], strides = [1, 1]} : vector<8x256xf32> to vector<8x128xf32>
    %35 = arith.addf %33, %34 : vector<8x128xf32>
    %36 = arith.addf %32, %35 : vector<8x128xf32>
    %c0_18 = arith.constant 0 : index
    %c0_19 = arith.constant 0 : index
    %37 = vector.load %arg9[%c0_18, %c0_19] : memref<8x128xf32, #tpu.memory_space<vmem>>, vector<8x128xf32>
    tpu.vector_store %arg9[%c0_18, %c0_19], %36 {strides = array<i32>} : memref<8x128xf32, #tpu.memory_space<vmem>>, vector<8x128xf32>,
    %c0_i32_20 = arith.constant 0 : i32
    %38 = arith.cmpi eq, %arg2, %c0_i32_20 : i32
    %39 = arith.extui %38 : i1 to i32
    %c0_i32_21 = arith.constant 0 : i32
    %40 = arith.cmpi ne, %39, %c0_i32_21 : i32
    scf.if %40 {
      %c0_25 = arith.constant 0 : index
      %c0_26 = arith.constant 0 : index
      %46 = vector.load %arg6[%c0_25, %c0_26] : memref<8x128xf32, #tpu.memory_space<vmem>>, vector<8x128xf32>
      %c0_27 = arith.constant 0 : index
      %c0_28 = arith.constant 0 : index
      %47 = vector.load %arg8[%c0_27, %c0_28] : memref<8x128xf32, #tpu.memory_space<vmem>>, vector<8x128xf32>
      %48 = arith.subf %46, %47 : vector<8x128xf32>
      %c0_29 = arith.constant 0 : index
      %c0_30 = arith.constant 0 : index
      %49 = vector.load %arg6[%c0_29, %c0_30] : memref<8x128xf32, #tpu.memory_space<vmem>>, vector<8x128xf32>
      tpu.vector_store %arg6[%c0_29, %c0_30], %48 {strides = array<i32>} : memref<8x128xf32, #tpu.memory_space<vmem>>, vector<8x128xf32>,
      %c0_31 = arith.constant 0 : index
      %c0_32 = arith.constant 0 : index
      %50 = vector.load %arg8[%c0_31, %c0_32] : memref<8x128xf32, #tpu.memory_space<vmem>>, vector<8x128xf32>
      %cst_33 = arith.constant dense<0.000000e+00> : vector<8xf32>
      %51 = vector.multi_reduction <add>, %50, %cst_33 [1] : vector<8x128xf32> to vector<8xf32>
      %52 = vector.shape_cast %51 : vector<8xf32> to vector<8x1xf32>
      %c0_34 = arith.constant 0 : index
      %c0_35 = arith.constant 0 : index
      %53 = vector.load %arg9[%c0_34, %c0_35] : memref<8x128xf32, #tpu.memory_space<vmem>>, vector<8x128xf32>
      %cst_36 = arith.constant dense<0.000000e+00> : vector<8xf32>
      %54 = vector.multi_reduction <add>, %53, %cst_36 [1] : vector<8x128xf32> to vector<8xf32>
      %55 = vector.shape_cast %54 : vector<8xf32> to vector<8x1xf32>
      %c0_37 = arith.constant 0 : index
      %c0_38 = arith.constant 0 : index
      %56 = vector.load %arg7[%c0_37, %c0_38] : memref<8x1xf32, #tpu.memory_space<vmem>>, vector<8x1xf32>
      %cst_39 = arith.constant 2.000000e+00 : f32
      %57 = vector.broadcast %cst_39 : f32 to vector<8x1xf32>
      %58 = arith.mulf %57, %52 : vector<8x1xf32>
      %cst_40 = arith.constant 1.000000e+00 : f32
      %59 = vector.broadcast %cst_40 : f32 to vector<8x1xf32>
      %60 = arith.addf %58, %59 : vector<8x1xf32>
      %cst_41 = arith.constant 1.000000e+00 : f32
      %61 = vector.broadcast %cst_41 : f32 to vector<8x1xf32>
      %62 = arith.addf %55, %61 : vector<8x1xf32>
      %63 = arith.divf %60, %62 : vector<8x1xf32>
      %cst_42 = arith.constant 1.000000e+00 : f32
      %64 = vector.broadcast %cst_42 : f32 to vector<8x1xf32>
      %65 = arith.subf %64, %63 : vector<8x1xf32>
      %66 = arith.addf %56, %65 : vector<8x1xf32>
      %c0_43 = arith.constant 0 : index
      %c0_44 = arith.constant 0 : index
      %67 = vector.load %arg7[%c0_43, %c0_44] : memref<8x1xf32, #tpu.memory_space<vmem>>, vector<8x1xf32>
      tpu.vector_store %arg7[%c0_43, %c0_44], %66 {strides = array<i32>} : memref<8x1xf32, #tpu.memory_space<vmem>>, vector<8x1xf32>,
    } else {
    }
    %c0_i32_22 = arith.constant 0 : i32
    %41 = arith.cmpi eq, %arg1, %c0_i32_22 : i32
    %c0_i32_23 = arith.constant 0 : i32
    %42 = arith.cmpi eq, %arg2, %c0_i32_23 : i32
    %43 = arith.andi %41, %42 : i1
    %44 = arith.extui %43 : i1 to i32
    %c0_i32_24 = arith.constant 0 : i32
    %45 = arith.cmpi ne, %44, %c0_i32_24 : i32
    scf.if %45 {
      %c0_25 = arith.constant 0 : index
      %c0_26 = arith.constant 0 : index
      %46 = vector.load %arg6[%c0_25, %c0_26] : memref<8x128xf32, #tpu.memory_space<vmem>>, vector<8x128xf32>
      %47 = vector.shape_cast %46 : vector<8x128xf32> to vector<1x8x128xf32>
      %cst_27 = arith.constant dense<0.000000e+00> : vector<1xf32>
      %48 = vector.multi_reduction <add>, %47, %cst_27 [1, 2] : vector<1x8x128xf32> to vector<1xf32>
      %49 = vector.shape_cast %48 : vector<1xf32> to vector<1x1x1xf32>
      %50 = vector.extract %49[0, 0, 0] : f32 from vector<1x1x1xf32>
      %cst_28 = arith.constant 4.8828125E-4 : f32
      %51 = arith.mulf %50, %cst_28 : f32
      %c0_29 = arith.constant 0 : index
      %c0_30 = arith.constant 0 : index
      %52 = vector.load %arg7[%c0_29, %c0_30] : memref<8x1xf32, #tpu.memory_space<vmem>>, vector<8x1xf32>
      %53 = vector.shape_cast %52 : vector<8x1xf32> to vector<1x8x1xf32>
      %cst_31 = arith.constant dense<0.000000e+00> : vector<1xf32>
      %54 = vector.multi_reduction <add>, %53, %cst_31 [1, 2] : vector<1x8x1xf32> to vector<1xf32>
      %55 = vector.shape_cast %54 : vector<1xf32> to vector<1x1x1xf32>
      %56 = vector.extract %55[0, 0, 0] : f32 from vector<1x1x1xf32>
      %cst_32 = arith.constant 1.250000e-01 : f32
      %57 = arith.mulf %56, %cst_32 : f32
      %58 = arith.addf %51, %57 : f32
      %59 = vector.broadcast %58 : f32 to vector<8x128xf32>
      %c0_33 = arith.constant 0 : index
      %c0_34 = arith.constant 0 : index
      %60 = vector.load %arg5[%c0_33, %c0_34] : memref<8x128xf32, #tpu.memory_space<vmem>>, vector<8x128xf32>
      tpu.vector_store %arg5[%c0_33, %c0_34], %59 {strides = array<i32>} : memref<8x128xf32, #tpu.memory_space<vmem>>, vector<8x128xf32>,
    } else {
    }
    return
  }
  func.func @transform_0(%arg0: i32, %arg1: i32, %arg2: i32) -> (i32, i32) {
    %c1_i32 = arith.constant 1 : i32
    %0 = arith.muli %arg0, %c1_i32 : i32
    %1 = arith.addi %0, %arg1 : i32
    %c0_i32 = arith.constant 0 : i32
    return %1, %arg2 : i32, i32
  }
  func.func @transform_1(%arg0: i32, %arg1: i32, %arg2: i32) -> (i32, i32) {
    %c1_i32 = arith.constant 1 : i32
    %0 = arith.muli %arg0, %c1_i32 : i32
    %1 = arith.addi %0, %arg1 : i32
    %c0_i32 = arith.constant 0 : i32
    return %1, %arg2 : i32, i32
  }
  func.func @transform_2(%arg0: i32, %arg1: i32, %arg2: i32) -> (i32, i32) {
    %c0_i32 = arith.constant 0 : i32
    %c0_i32_0 = arith.constant 0 : i32
    return %arg0, %c0_i32 : i32, i32
  }
}

</mosaic_0001>

<bundles_post_ra>
// kernel: tpu_custom_call.1
= control target key start
LH: loop header
LB: loop body
LE: loop exit
PB: predicated region body
PF: predicated region fallthrough
CT: control target
= control target key end

     0   :  { %7 = vsyncpa [#allocation7], 0  ;;  %s326_s0 = inlined_call_operand.hbm [shape: f32[8,256], index: 0, kind: input, shape index: {}]   ;;  %s327_s1 = inlined_call_operand.hbm [shape: f32[8,256], index: 1, kind: input, shape index: {}]   ;;  %s328_s2 = inlined_call_operand.hbm [shape: f32[8,128], index: 2, kind: output, shape index: {}]  }
   0x1   :  { %8 = vsyncpa [#allocation10], 0 }
   0x2   :  { %9 = vsyncpa [#allocation8], 0  ;;  %s268_s9 = smov [#allocation6]   ;;  %s269_s11 = smov [#allocation9]  }
   0x3   :  { %s20_s10 = sshll.u32 %s268_s9, 4  ;;  %s34_s12 = sshll.u32 %s269_s11, 4  ;;  %s21_s10 = int_to_ptr.vmem [resolvable:$true] %s20_s10  ;;  %s35_s12 = int_to_ptr.vmem [resolvable:$true] %s34_s12 }
   0x4   :  { %s196_s15 = scalar_lea.hbm %s326_s0, 256 }
   0x5   :  { %p197_p0 = scmp.ne.s32.totalorder %s326_s0, %s196_s15  ;;  %p200_p1 = scmp.lt.u32.totalorder %s196_s15, %s326_s0 }
   0x7   :  { %p202_p2 = pnand %p200_p1, %p197_p0 }
   0x9   :  { %205 = shalt.err (!%p202_p2)
}
   0xa   :  { %s206_s20 = scalar_lea.vmem %s21_s10, 256  ;;  %p211_p4 = scmp.lt.s32.totalorder %s21_s10, %s21_s10 }
   0xb   :  { %p207_p3 = scmp.ne.s32.totalorder %s21_s10, %s206_s20  ;;  %p212_p5 = scmp.lt.s32.totalorder %s206_s20, %s206_s20 }
   0xd   :  { %p213_p6 = por %p212_p5, %p211_p4 }
   0xf   :  { %p214_p7 = pnand %p213_p6, %p207_p3 }
  0x11   :  { %217 = shalt.err (!%p214_p7)
}
  0x12   :  { %23 = dma.hbm_to_vmem [thread:$0]  %s326_s0, 256, %s21_s10, [#allocation7]  }
  0x13   :  { %s218_s25 = scalar_lea.hbm %s327_s1, 256 }
  0x14   :  { %p219_p8 = scmp.ne.s32.totalorder %s327_s1, %s218_s25  ;;  %p222_p9 = scmp.lt.u32.totalorder %s218_s25, %s327_s1 }
  0x16   :  { %p224_p10 = pnand %p222_p9, %p219_p8 }
  0x18   :  { %227 = shalt.err (!%p224_p10)
}
  0x19   :  { %s228_s30 = scalar_lea.vmem %s35_s12, 256  ;;  %p233_p12 = scmp.lt.s32.totalorder %s35_s12, %s35_s12 }
  0x1a   :  { %p229_p11 = scmp.ne.s32.totalorder %s35_s12, %s228_s30  ;;  %p234_p13 = scmp.lt.s32.totalorder %s228_s30, %s228_s30 }
  0x1c   :  { %p235_p0 = por %p234_p13, %p233_p12 }
  0x1e   :  { %p236_p1 = pnand %p235_p0, %p229_p11 }
  0x20   :  { %239 = shalt.err (!%p236_p1)
}
  0x21   :  { %37 = dma.hbm_to_vmem [thread:$0]  %s327_s1, 256, %s35_s12, [#allocation10]  }
  0x22   :  { %262 = dma.done.wait [#allocation7], 256  }
  0x23   :  { %263 = vsyncadd [#allocation7], 4294967040 }
  0x24   :  { %264 = dma.done.wait [#allocation10], 256  }
  0x25   :  { %265 = vsyncadd [#allocation10], 4294967040  ;;  %v60_v0 = vld [vmem:[#allocation6] sm:$0xff]  ;;  %v61_v1 = vld [vmem:[#allocation6 + $0x8] sm:$0xff]  ;;  %vm53_vm0 = vcmask 7168   ;;  %v270_v27 = vmov 0.0  }
  0x26   :  { %v62_v2 = vld [vmem:[#allocation9] sm:$0xff]  ;;  %v63_v3 = vld [vmem:[#allocation9 + $0x8] sm:$0xff]  ;;  %v67_v4 = vand.u32 2147483647, %v61_v1  ;;  %v66_v6 = vand.u32 2147483647, %v60_v0 }
  0x27   :  { %v96_v5 = vadd.f32 %v62_v2, %v60_v0  ;;  %v97_v7 = vadd.f32 %v63_v3, %v61_v1  ;;  %v94_v8 = vmul.f32 %v62_v2, %v60_v0  ;;  %v95_v9 = vmul.f32 %v63_v3, %v61_v1  ;;  %54 = vst.msk [vmem:[#allocation3] sm:$0xff] %vm53_vm0, %v270_v27  ;;  %s271_s7 = smov [#allocation11]  }
  0x28   :  { %v69_v10 = vsub.f32 0.0, %v67_v4  ;;  %v68_v11 = vsub.f32 0.0, %v66_v6  ;;  %v65_v29 = vmax.f32 %v61_v1, 0.0  ;;  %v64_v32 = vmax.f32 %v60_v0, 0.0  ;;  %s168_s8 = sshll.u32 %s271_s7, 4  ;;  %s169_s8 = int_to_ptr.vmem [resolvable:$true] %s168_s8 }
  0x29   :  { %v107_v12 = vadd.f32 %v97_v7, %v96_v5  ;;  %v103_v15 = vadd.f32 %v95_v9, %v94_v8  ;;  %s240_s10 = scalar_lea.vmem %s169_s8, 128  ;;  %p245_p3 = scmp.lt.s32.totalorder %s169_s8, %s169_s8 }
  0x2a   :  { %v72_v13 = vmul.f32 1.442695, %v69_v10  ;;  %v70_v14 = vmul.f32 1.442695, %v68_v11  ;;  %p241_p2 = scmp.ne.s32.totalorder %s169_s8, %s240_s10  ;;  %p246_p4 = scmp.lt.s32.totalorder %s240_s10, %s240_s10 }
  0x2b   :  { %121 = vadd.xlane.f32.xlu0 %v107_v12 }
  0x2c   :  { %186 = vpow2.f32 %v72_v13  ;;  %p247_p5 = por %p246_p4, %p245_p3 }
  0x2d   :  { %188 = vpow2.f32 %v70_v14 }
  0x2e   :  { %v123_v48 = vld [vmem:[#allocation3] sm:$0xff]  ;;  %p248_p6 = pnand %p247_p5, %p241_p2 }
  0x2f   :  { %118 = vadd.xlane.f32.xlu0 %v103_v15 }
  0x36   :  { %v187_v16 = vpop.eup %186 }
  0x37   :  { %v189_v17 = vpop.eup %188  ;;  %v83_v18 = vadd.f32 1.0, %v187_v16  ;;  %v86_v21 = vmul.f32 -0.5, %v187_v16  ;;  %v89_v25 = vand.u32 2147483647, %v187_v16 }
  0x38   :  { %v74_v19 = vadd.f32 1.0, %v189_v17  ;;  %v77_v20 = vmul.f32 -0.5, %v189_v17  ;;  %v80_v24 = vand.u32 2147483647, %v189_v17 }
  0x39   :  { %190 = vlog2.f32 %v83_v18  ;;  %v87_v23 = vadd.f32 1.0, %v86_v21  ;;  %vm90_vm1 = vcmp.lt.f32.partialorder %v89_v25, 0.0004427343 }
  0x3a   :  { %192 = vlog2.f32 %v74_v19  ;;  %v78_v22 = vadd.f32 1.0, %v77_v20  ;;  %vm81_vm2 = vcmp.lt.f32.partialorder %v80_v24, 0.0004427343 }
  0x3b   :  { %v88_v26 = vmul.f32 %v187_v16, %v87_v23 }
  0x3c   :  { %v79_v30 = vmul.f32 %v189_v17, %v78_v22 }
  0x43   :  { %v191_v28 = vpop.eup %190 }
  0x44   :  { %v193_v31 = vpop.eup %192  ;;  %v85_v33 = vmul.f32 0.6931472, %v191_v28 }
  0x45   :  { %v76_v34 = vmul.f32 0.6931472, %v193_v31 }
  0x46   :  { %v91_v35 = vsel %vm90_vm1, %v88_v26, %v85_v33 }
  0x47   :  { %v82_v36 = vsel %vm81_vm2, %v79_v30, %v76_v34  ;;  %v93_v37 = vadd.f32 %v91_v35, %v65_v29 }
  0x48   :  { %v92_v38 = vadd.f32 %v82_v36, %v64_v32 }
  0x4a   :  { %v99_v39 = vadd.f32 %v93_v37, %v92_v38 }
  0x4c   :  { %v115_v40 = vsub.f32 %v99_v39, %v103_v15 }
  0x4e   :  { %136 = vadd.xlane.f32.xlu1 %v115_v40 }
  0xb8   :  { %v122_v41 = vpop.xlane.xlu0 %121 }
  0xb9   :  { %v126_v42 = vadd.f32 1.0, %v122_v41 }
  0xbb   :  { %194 = vrcp.f32 %v126_v42 }
  0xbc   :  { %v119_v43 = vpop.xlane.xlu0 %118 }
  0xbd   :  { %v124_v44 = vmul.f32 2.0, %v119_v43 }
  0xbf   :  { %v125_v45 = vadd.f32 1.0, %v124_v44 }
  0xc5   :  { %v195_v46 = vpop.eup %194 }
  0xc6   :  { %v128_v47 = vmul.f32 %v195_v46, %v125_v45 }
  0xc8   :  { %v129_v49 = vsub.f32 1.0, %v128_v47 }
  0xca   :  { %v130_v50 = vadd.f32 %v129_v49, %v123_v48 }
  0xcc   :  { %132 = vst.msk [vmem:[#allocation3] sm:$0xff] %vm53_vm0, %v130_v50 }
  0xd3   :  { %v146_v51 = vld [vmem:[#allocation3] sm:$0xff] }
  0xd4   :  { %v148_v52 = vsel %vm53_vm0, %v146_v51, 0.0 }
  0xd5   :  { %149 = vadd.xlane.f32.xlu1 %v148_v52 }
  0xdb   :  { %v137_v53 = vpop.xlane.xlu1 %136 }
  0xdc   :  { %v138_v54 = vrot.slane %v137_v53, 4 }
  0xde   :  { %v139_v55 = vadd.f32 %v138_v54, %v137_v53 }
  0xe0   :  { %v140_v56 = vrot.slane %v139_v55, 2 }
  0xe2   :  { %v141_v57 = vadd.f32 %v140_v56, %v139_v55 }
  0xe4   :  { %v142_v58 = vrot.slane %v141_v57, 1 }
  0xe6   :  { %v143_v59 = vadd.f32 %v142_v58, %v141_v57 }
  0xe8   :  { %178 = vpush %v143_v59 }
 0x119   :  { %s179_s1 = spop %178 }
 0x11a   :  { %s145_s4 = smul.f32 0.00048828125, %s179_s1 }
 0x162   :  { %v150_v60 = vpop.xlane.xlu1 %149 }
 0x163   :  { %v151_v61 = vrot.slane %v150_v60, 4 }
 0x165   :  { %v152_v62 = vadd.f32 %v151_v61, %v150_v60 }
 0x167   :  { %v153_v63 = vrot.slane %v152_v62, 2 }
 0x169   :  { %v154_v0 = vadd.f32 %v153_v63, %v152_v62 }
 0x16b   :  { %v155_v1 = vrot.slane %v154_v0, 1 }
 0x16d   :  { %v156_v2 = vadd.f32 %v155_v1, %v154_v0 }
 0x16f   :  { %180 = vpush %v156_v2 }
 0x1a0   :  { %s181_s5 = spop %180 }
 0x1a1   :  { %s158_s6 = smul.f32 0.125, %s181_s5 }
 0x1a3   :  { %s159_s9 = sadd.f32 %s158_s6, %s145_s4 }
 0x1a5   :  { %v160_v3 = vstv %s159_s9 }
 0x1a6   :  { %161 = vst [vmem:[#allocation11] sm:$0xff] %v160_v3 }
 0x1a7   :  { %251 = shalt.err (!%p248_p6)
}
 0x1a8   :  { %s252_s13 = scalar_lea.hbm %s328_s2, 128 }
 0x1a9   :  { %p253_p7 = scmp.ne.s32.totalorder %s328_s2, %s252_s13  ;;  %p256_p8 = scmp.lt.u32.totalorder %s252_s13, %s328_s2 }
 0x1ab   :  { %p258_p9 = pnand %p256_p8, %p253_p7 }
 0x1ad   :  { %261 = shalt.err (!%p258_p9)
}
 0x1ae   :  { %171 = dma.vmem_to_hbm [thread:$0]  %s169_s8, 128, %s328_s2, [#allocation8]  }
 0x1af   :  { %266 = dma.done.wait [#allocation8], 128  }
 0x1b0   :  { %267 = vsyncadd [#allocation8], 4294967168 }
 0x1b1   :  { %175 = vsyncpa [#allocation7], 1 }
 0x1b2   :  { %176 = vsyncpa [#allocation10], 1 }
 0x1b3   :  { %177 = vsyncpa [#allocation8], 1 }

</bundles_post_ra>
